<compile_context>
chip_gen: v6e
topology: v6e:2x2x1
jax: 0.10.0
libtpu: 0.0.40
codegen_flags: <defaults>
</compile_context>

<pallas_src>
import functools
import math

import jax
import jax.numpy as jnp
from jax.experimental import pallas as pl
from jax.experimental.pallas import tpu as pltpu

_LANES = 128
_TARGET_BLOCK_BYTES = 4 << 20      # ~4 MiB per x block (review item 5)
_MIN_GRID_STEPS = 8                # keep both v7x TCs fed + pipeline overlap (item 6)


# ----------------------------- hw-aware budgets ----------------------------- #

def _sublane_pack(itemsize):
    # dtype-dependent sublane packing: f32 -> 8, bf16 -> 16, int8/fp8 -> 32.
    return max(8, 32 // max(int(itemsize), 1))


@functools.lru_cache(maxsize=None)
def _vmem_limit_bytes():
    """Generation-aware scoped-VMEM budget (review item 7)."""
    cap = None
    try:
        cap = getattr(pltpu.get_tpu_info(), "vmem_capacity_bytes", None)
    except Exception:
        cap = None
    if cap is None:
        cap = 64 << 20
    # v5e/v6e: 128 MiB physical -> allow 64 MiB scoped; v7x: 64 MiB -> cap at 48 MiB.
    return (64 << 20) if cap >= (100 << 20) else (48 << 20)


def _compiler_params(dimension_semantics):
    return pltpu.CompilerParams(
        dimension_semantics=dimension_semantics,
        vmem_limit_bytes=_vmem_limit_bytes())


# ----------------------------- kernels ------------------------------------- #

def _ln_cl_grouped_kernel(x_ref, seg_ref, w_ref, b_ref, o_ref, *, eps, inv_c):
    # x_ref: (tm, 128) — G = 128 // C original rows folded into the lane axis.
    # seg_ref: (128, 128) f32 block-diagonal ones; x @ seg = per-group sum
    # broadcast back to every lane of the group (lane-dense segmented reduce
    # on the MXU).
    x = x_ref[...].astype(jnp.float32)
    seg = seg_ref[...]
    # Two *independent* MXU reductions (over x and x*x) issued back-to-back,
    # instead of segsum((x - mean)^2) which serialized MXU -> VPU -> MXU
    # (perf review item 3).  precision=HIGHEST avoids bf16 truncation of the
    # f32 operands (correctness concern 1).
    s1 = jnp.dot(x, seg, precision=jax.lax.Precision.HIGHEST,
                 preferred_element_type=jnp.float32)
    s2 = jnp.dot(x * x, seg, precision=jax.lax.Precision.HIGHEST,
                 preferred_element_type=jnp.float32)
    mean = s1 * inv_c
    # E[x^2] - mean^2 (clamped at 0).  Mild cancellation if |mean| >> std; the
    # review accepted the trade — keep the stable form if inputs have large
    # DC offsets.
    var = jnp.maximum(s2 * inv_c - mean * mean, 0.0)
    y = (x - mean) * jax.lax.rsqrt(var + eps)
    o_ref[...] = (y * w_ref[...] + b_ref[...]).astype(o_ref.dtype)


def _ln_cl_rows_kernel(x_ref, w_ref, b_ref, o_ref, *, eps):
    # Plain per-row LayerNorm over the trailing axis; used when C >= 128 or C
    # does not divide 128.  x_ref: (tm, C), w_ref/b_ref: (1, C) f32.
    x = x_ref[...].astype(jnp.float32)
    mean = jnp.mean(x, axis=-1, keepdims=True)
    xc = x - mean
    var = jnp.mean(xc * xc, axis=-1, keepdims=True)           # biased, like F.layer_norm
    y = xc * jax.lax.rsqrt(var + eps)
    o_ref[...] = (y * w_ref[...] + b_ref[...]).astype(o_ref.dtype)


def _ln_cf_kernel(x_ref, w_ref, b_ref, o_ref, *, eps):
    # channels_first: x_ref: (C, thw) (leading batch dim squeezed by BlockSpec),
    # normalize over the channel (sublane) axis per spatial position.
    # TODO(synk): for C < 8 only C of 8 sublanes per vreg are used; fine while
    # DMA-bound (review item 9 - low priority).
    x = x_ref[...].astype(jnp.float32)
    u = jnp.mean(x, axis=0, keepdims=True)
    xc = x - u
    s = jnp.mean(xc * xc, axis=0, keepdims=True)
    y = xc * jax.lax.rsqrt(s + eps)                            # rsqrt -> EUP slot
    o_ref[...] = (w_ref[...] * y + b_ref[...]).astype(o_ref.dtype)


# ----------------------------- tiling helpers ------------------------------- #

def _pick_row_tile(rows, row_width, itemsize):
    """Rows per block: ~_TARGET_BLOCK_BYTES, dtype-packed, >= _MIN_GRID_STEPS steps."""
    pack = _sublane_pack(itemsize)
    t = (_TARGET_BLOCK_BYTES // (itemsize * max(row_width, 1))) // pack * pack
    t = max(pack, t)
    cap = (rows // _MIN_GRID_STEPS) // pack * pack
    if cap >= pack:
        t = min(t, cap)
    return rows if t >= rows else t


def _pick_lane_tile(hw, c, itemsize, min_steps):
    """Lanes per block (multiple of 128), byte-budgeted, with a min-grid cap."""
    t = (_TARGET_BLOCK_BYTES // (itemsize * max(c, 1))) // _LANES * _LANES
    t = max(_LANES, t)
    cap = (hw // max(min_steps, 1)) // _LANES * _LANES
    if cap >= _LANES:
        t = min(t, cap)
    return hw if t >= hw else t


# ----------------------------- wrappers ------------------------------------ #

def _ln_cl_grouped_call(x2, w32, b32, eps):
    m, c = x2.shape
    g = _LANES // c
    # Review item 1: pad M to a multiple of G so this lane-dense path is taken
    # whenever 128 % C == 0; pad rows (zeros) are sliced off afterwards.
    pad = (-m) % g
    if pad:
        x2 = jnp.pad(x2, ((0, pad), (0, 0)))
    mp = m + pad
    mg = mp // g
    xg = x2.reshape(mg, _LANES)                       # free: memory-contiguous regroup
    wt = jnp.tile(w32, g).reshape(1, _LANES)          # lane l -> weight[l % C]
    bt = jnp.tile(b32, g).reshape(1, _LANES)
    lane = jnp.arange(_LANES)
    seg = (lane[:, None] // c == lane[None, :] // c).astype(jnp.float32)

    tm = _pick_row_tile(mg, _LANES, x2.dtype.itemsize)
    out = pl.pallas_call(
        functools.partial(_ln_cl_grouped_kernel, eps=eps, inv_c=1.0 / c),
        out_shape=jax.ShapeDtypeStruct((mg, _LANES), x2.dtype),
        grid=(pl.cdiv(mg, tm),),
        in_specs=[
            pl.BlockSpec((tm, _LANES), lambda i: (i, 0)),
            pl.BlockSpec((_LANES, _LANES), lambda i: (0, 0)),   # constant, reloaded cheap
            pl.BlockSpec((1, _LANES), lambda i: (0, 0)),
            pl.BlockSpec((1, _LANES), lambda i: (0, 0)),
        ],
        out_specs=pl.BlockSpec((tm, _LANES), lambda i: (i, 0)),
        compiler_params=_compiler_params(("parallel",)),
    )(xg, seg, wt, bt)
    out = out.reshape(mp, c)
    return out[:m] if pad else out


def _ln_cl_rows_call(x2, w32, b32, eps):
    m, c = x2.shape
    tm = _pick_row_tile(m, c, x2.dtype.itemsize)
    out = pl.pallas_call(
        functools.partial(_ln_cl_rows_kernel, eps=eps),
        out_shape=jax.ShapeDtypeStruct((m, c), x2.dtype),
        grid=(pl.cdiv(m, tm),),
        in_specs=[
            pl.BlockSpec((tm, c), lambda i: (i, 0)),
            pl.BlockSpec((1, c), lambda i: (0, 0)),
            pl.BlockSpec((1, c), lambda i: (0, 0)),
        ],
        out_specs=pl.BlockSpec((tm, c), lambda i: (i, 0)),
        compiler_params=_compiler_params(("parallel",)),
    )(x2, w32.reshape(1, c), b32.reshape(1, c))
    return out


def layer_norm_channels_last(x, weight, bias, eps=1e-6):
    """LayerNorm over the trailing channel axis of x (..., C)."""
    orig_shape = x.shape
    c = orig_shape[-1]
    m = math.prod(orig_shape[:-1]) if len(orig_shape) > 1 else 1
    x2 = x.reshape(m, c)
    w32 = weight.astype(jnp.float32)
    b32 = bias.astype(jnp.float32)

    if c < _LANES and _LANES % c == 0:
        out = _ln_cl_grouped_call(x2, w32, b32, eps)   # lane-dense MXU path (small C)
    else:
        # TODO(synk): C < 128 with 128 % C != 0 (e.g. 48, 96) still uses this
        # masked-store rows path; a lane-dense lcm(C,128) fold (review item 2)
        # is left for a future revision.
        out = _ln_cl_rows_call(x2, w32, b32, eps)
    return out.reshape(orig_shape)


def layer_norm_channels_first(x, weight, bias, eps=1e-6):
    """LayerNorm over the channel axis (dim 1) of NCHW x."""
    b_, c = x.shape[0], x.shape[1]
    hw = math.prod(x.shape[2:]) if len(x.shape) > 2 else 1
    x3 = x.reshape(b_, c, hw)
    w32 = weight.astype(jnp.float32).reshape(c, 1)
    bias32 = bias.astype(jnp.float32).reshape(c, 1)

    min_hw_steps = pl.cdiv(_MIN_GRID_STEPS, max(b_, 1))
    thw = _pick_lane_tile(hw, c, x.dtype.itemsize, min_hw_steps)
    out = pl.pallas_call(
        functools.partial(_ln_cf_kernel, eps=eps),
        out_shape=jax.ShapeDtypeStruct((b_, c, hw), x.dtype),
        grid=(b_, pl.cdiv(hw, thw)),
        in_specs=[
            # Leading None squeezes the per-batch dim -> kernel sees (C, thw).
            pl.BlockSpec((None, c, thw), lambda i, j: (i, 0, j)),
            pl.BlockSpec((c, 1), lambda i, j: (0, 0)),
            pl.BlockSpec((c, 1), lambda i, j: (0, 0)),
        ],
        out_specs=pl.BlockSpec((None, c, thw), lambda i, j: (i, 0, j)),
        compiler_params=_compiler_params(("parallel", "parallel")),
    )(x3, w32, bias32)
    return out.reshape(x.shape)


def layer_norm(x, weight, bias, eps=1e-6, data_format="channels_last"):
    if data_format == "channels_last":
        return layer_norm_channels_last(x, weight, bias, eps)
    elif data_format == "channels_first":
        return layer_norm_channels_first(x, weight, bias, eps)
    raise NotImplementedError(data_format)


# ------------------------- pure-JAX references ------------------------------ #

def _ref_channels_last(x, w, b, eps):
    mean = jnp.mean(x, axis=-1, keepdims=True)
    var = jnp.mean((x - mean) ** 2, axis=-1, keepdims=True)
    return (x - mean) * jax.lax.rsqrt(var + eps) * w + b


def _ref_channels_first(x, w, b, eps):
    u = jnp.mean(x, axis=1, keepdims=True)
    s = jnp.mean((x - u) ** 2, axis=1, keepdims=True)
    xn = (x - u) / jnp.sqrt(s + eps)
    return w[:, None, None] * xn + b[:, None, None]


# --------------------------------- main ------------------------------------ #

if __name__ == "__main__":
    key = jax.random.PRNGKey(0)
    k1, k2, k3, k4, k5, k6, k7, k8 = jax.random.split(key, 8)

    eps = 1e-6
    C = 4
    # Module inits weight=ones, bias=zeros; perturb deterministically so the
    # affine part is exercised.
    weight = jnp.ones((C,), jnp.float32) + 0.1 * jax.random.normal(k3, (C,), jnp.float32)
    bias = jnp.zeros((C,), jnp.float32) + 0.1 * jax.random.normal(k4, (C,), jnp.float32)

    # channels_first: NCHW input (2, 4, 16, 16), normalized over dim 1
    x_cf = jax.random.normal(k1, (2, C, 16, 16), jnp.float32)
    y_cf = jax.block_until_ready(layer_norm(x_cf, weight, bias, eps, "channels_first"))
    ref_cf = _ref_channels_first(x_cf, weight, bias, eps)
    assert y_cf.shape == x_cf.shape and y_cf.dtype == x_cf.dtype
    assert jnp.allclose(y_cf, ref_cf, atol=1e-5, rtol=1e-5)

    # channels_last, small C (lane-folded MXU path, M divisible by G): (2, 16, 16, 4)
    # Tolerance 2e-5: the decoupled var = E[x^2] - mean^2 form (review item 3)
    # carries a small, benign cancellation term vs the two-pass reference.
    x_cl = jax.random.normal(k2, (2, 16, 16, C), jnp.float32)
    y_cl = jax.block_until_ready(layer_norm(x_cl, weight, bias, eps, "channels_last"))
    ref_cl = _ref_channels_last(x_cl, weight, bias, eps)
    assert y_cl.shape == x_cl.shape and y_cl.dtype == x_cl.dtype
    assert jnp.allclose(y_cl, ref_cl, atol=2e-5, rtol=1e-5)

    # channels_last, small C with M NOT a multiple of G (exercises the pad path)
    x_odd = jax.random.normal(k8, (2, 5, C), jnp.float32)
    y_odd = jax.block_until_ready(layer_norm(x_odd, weight, bias, eps, "channels_last"))
    ref_odd = _ref_channels_last(x_odd, weight, bias, eps)
    assert y_odd.shape == x_odd.shape and y_odd.dtype == x_odd.dtype
    assert jnp.allclose(y_odd, ref_odd, atol=2e-5, rtol=1e-5)

    # channels_last, wide C (plain lane-dense row path): (2, 8, 256)
    C2 = 256
    w2 = jnp.ones((C2,), jnp.float32) + 0.1 * jax.random.normal(k6, (C2,), jnp.float32)
    b2 = jnp.zeros((C2,), jnp.float32) + 0.1 * jax.random.normal(k7, (C2,), jnp.float32)
    x_wide = jax.random.normal(k5, (2, 8, C2), jnp.float32)
    y_wide = jax.block_until_ready(layer_norm(x_wide, w2, b2, eps, "channels_last"))
    ref_wide = _ref_channels_last(x_wide, w2, b2, eps)
    assert y_wide.shape == x_wide.shape and y_wide.dtype == x_wide.dtype
    assert jnp.allclose(y_wide, ref_wide, atol=1e-5, rtol=1e-5)

    print("KERNEL_OK")
</pallas_src>

<mosaic_0001>
module attributes {stable_mosaic.version = 11 : i64} {
  func.func @_ln_cf_kernel(%arg0: i32, %arg1: i32, %arg2: memref<1x4x256xf32, #tpu.memory_space<vmem>>, %arg3: memref<4x1xf32, #tpu.memory_space<vmem>>, %arg4: memref<4x1xf32, #tpu.memory_space<vmem>>, %arg5: memref<1x4x256xf32, #tpu.memory_space<vmem>>) attributes {dimension_semantics = [#tpu.dimension_semantics<parallel>, #tpu.dimension_semantics<parallel>], iteration_bounds = array<i64: 2, 1>, scalar_prefetch = 0 : i64, scratch_operands = 0 : i64, tpu.core_type = #tpu.core_type<tc>, window_params = [{transform_indices = @transform_0, window_bounds = array<i64: 1, 4, 256>}, {pipeline_mode = #tpu.pipeline_mode<synchronous>, transform_indices = @transform_1, window_bounds = array<i64: 4, 1>}, {pipeline_mode = #tpu.pipeline_mode<synchronous>, transform_indices = @transform_2, window_bounds = array<i64: 4, 1>}, {transform_indices = @transform_3, window_bounds = array<i64: 1, 4, 256>}]} {
    %c0 = arith.constant 0 : index
    %c0_0 = arith.constant 0 : index
    %c0_1 = arith.constant 0 : index
    %0 = vector.load %arg2[%c0, %c0_0, %c0_1] : memref<1x4x256xf32, #tpu.memory_space<vmem>>, vector<1x4x256xf32>
    %1 = vector.shape_cast %0 : vector<1x4x256xf32> to vector<4x256xf32>
    %cst = arith.constant dense<0.000000e+00> : vector<256xf32>
    %2 = vector.multi_reduction <add>, %1, %cst [0] : vector<4x256xf32> to vector<256xf32>
    %3 = vector.shape_cast %2 : vector<256xf32> to vector<1x256xf32>
    %cst_2 = arith.constant 4.000000e+00 : f32
    %4 = vector.broadcast %cst_2 : f32 to vector<1x256xf32>
    %5 = arith.divf %3, %4 : vector<1x256xf32>
    %6 = vector.broadcast %5 : vector<1x256xf32> to vector<4x256xf32>
    %7 = arith.subf %1, %6 : vector<4x256xf32>
    %8 = arith.mulf %7, %7 : vector<4x256xf32>
    %cst_3 = arith.constant dense<0.000000e+00> : vector<256xf32>
    %9 = vector.multi_reduction <add>, %8, %cst_3 [0] : vector<4x256xf32> to vector<256xf32>
    %10 = vector.shape_cast %9 : vector<256xf32> to vector<1x256xf32>
    %cst_4 = arith.constant 4.000000e+00 : f32
    %11 = vector.broadcast %cst_4 : f32 to vector<1x256xf32>
    %12 = arith.divf %10, %11 : vector<1x256xf32>
    %cst_5 = arith.constant 9.99999997E-7 : f32
    %13 = vector.broadcast %cst_5 : f32 to vector<1x256xf32>
    %14 = arith.addf %12, %13 : vector<1x256xf32>
    %15 = math.rsqrt %14 : vector<1x256xf32>
    %16 = vector.broadcast %15 : vector<1x256xf32> to vector<4x256xf32>
    %17 = arith.mulf %7, %16 : vector<4x256xf32>
    %c0_6 = arith.constant 0 : index
    %c0_7 = arith.constant 0 : index
    %18 = vector.load %arg3[%c0_6, %c0_7] : memref<4x1xf32, #tpu.memory_space<vmem>>, vector<4x1xf32>
    %19 = vector.broadcast %18 : vector<4x1xf32> to vector<4x256xf32>
    %20 = arith.mulf %19, %17 : vector<4x256xf32>
    %c0_8 = arith.constant 0 : index
    %c0_9 = arith.constant 0 : index
    %21 = vector.load %arg4[%c0_8, %c0_9] : memref<4x1xf32, #tpu.memory_space<vmem>>, vector<4x1xf32>
    %22 = vector.broadcast %21 : vector<4x1xf32> to vector<4x256xf32>
    %23 = arith.addf %20, %22 : vector<4x256xf32>
    %c0_10 = arith.constant 0 : index
    %c0_11 = arith.constant 0 : index
    %c0_12 = arith.constant 0 : index
    %24 = vector.load %arg5[%c0_10, %c0_11, %c0_12] : memref<1x4x256xf32, #tpu.memory_space<vmem>>, vector<1x4x256xf32>
    %25 = vector.shape_cast %24 : vector<1x4x256xf32> to vector<4x256xf32>
    %26 = vector.shape_cast %23 : vector<4x256xf32> to vector<1x4x256xf32>
    tpu.vector_store %arg5[%c0_10, %c0_11, %c0_12], %26 {strides = array<i32>} : memref<1x4x256xf32, #tpu.memory_space<vmem>>, vector<1x4x256xf32>,
    return
  }
  func.func @transform_0(%arg0: i32, %arg1: i32) -> (i32, i32, i32) {
    %c0_i32 = arith.constant 0 : i32
    %c0_i32_0 = arith.constant 0 : i32
    return %arg0, %c0_i32, %arg1 : i32, i32, i32
  }
  func.func @transform_1(%arg0: i32, %arg1: i32) -> (i32, i32) {
    %c0_i32 = arith.constant 0 : i32
    %c0_i32_0 = arith.constant 0 : i32
    %c0_i32_1 = arith.constant 0 : i32
    return %c0_i32, %c0_i32_0 : i32, i32
  }
  func.func @transform_2(%arg0: i32, %arg1: i32) -> (i32, i32) {
    %c0_i32 = arith.constant 0 : i32
    %c0_i32_0 = arith.constant 0 : i32
    %c0_i32_1 = arith.constant 0 : i32
    return %c0_i32, %c0_i32_0 : i32, i32
  }
  func.func @transform_3(%arg0: i32, %arg1: i32) -> (i32, i32, i32) {
    %c0_i32 = arith.constant 0 : i32
    %c0_i32_0 = arith.constant 0 : i32
    return %arg0, %c0_i32, %arg1 : i32, i32, i32
  }
}

</mosaic_0001>

<bundles_post_ra>
// kernel: tpu_custom_call.1
= control target key start
LH: loop header
LB: loop body
LE: loop exit
PB: predicated region body
PF: predicated region fallthrough
CT: control target
= control target key end

     0   :  { %8 = vsyncpa [#allocation3], 0  ;;  %s755_s0 = inlined_call_operand.hbm [shape: f32[2,4,256], index: 0, kind: input, shape index: {}]   ;;  %s756_s1 = inlined_call_operand.vmem [shape: f32[4,1], index: 1, kind: input, shape index: {}]   ;;  %s757_s2 = inlined_call_operand.vmem [shape: f32[4,1], index: 2, kind: input, shape index: {}]   ;;  %s758_s3 = inlined_call_operand.hbm [shape: f32[2,4,256], index: 3, kind: output, shape index: {}]  }
   0x1   :  { %10 = vsyncpa [#allocation3 + $0x1], 0 }
   0x2   :  { %11 = vsyncpa [#allocation4], 0 }
   0x3   :  { %13 = vsyncpa [#allocation4 + $0x1], 0  ;;  %s607_s12 = smov 0   ;;  %s609_s13 = smov 0  }
   0x4   :  { %s611_s14 = smov 0   ;;  %s613_s15 = smov 0  }
   0x5   :  { %s615_s16 = smov 0   ;;  %s617_s17 = smov 0  }
   0x6 LB: > { %s388_s18 = sadd.s32 4294967295, %s582_s17   ;;  %s389_s19 = sadd.s32 4294967294, %s582_s17   ;;  %s582_s17 = sphi %s617_s17, %s19_s17   ;;  %s578_s16 = sphi %s615_s16, %s770_s16   ;;  %s574_s15 = sphi %s613_s15, %s769_s15   ;;  %s570_s14 = sphi %s611_s14, %s768_s14   ;;  %s566_s13 = sphi %s609_s13, %s767_s13   ;;  %s562_s12 = sphi %s607_s12, %s766_s12  }
   0x7   : > { %s31_s20 = sadd.s32 1, %s578_s16  ;;  %s40_s21 = sadd.s32 1, %s570_s14 }
   0x8   : > { %p33_p0 = scmp.ge.s32.totalorder %s31_s20, 2  ;;  %p47_p1 = scmp.ne.s32.totalorder %s570_s14, %s566_s13 }
   0x9   : > { %p48_p2 = scmp.eq.s32.totalorder %s582_s17, 0  ;;  %p53_p3 = scmp.ne.s32.totalorder %s566_s13, %s562_s12 }
   0xa   : > { %s772_s20 = smov (%p33_p0, %s31_s20), 0  ;;  %p54_p5 = scmp.eq.s32.totalorder %s388_s18, 0 }
   0xb   : > { %p648_p4 = por %p48_p2, %p47_p1  ;;  %s35_s23 = ssub.s32 %s578_s16, %s772_s20 }
   0xc   : > { %p121_p6 = scmp.eq.s32.totalorder %s388_s18, 1  ;;  %p38_p7 = scmp.eq.s32.totalorder %s35_s23, 0 }
   0xd   : > { %p654_p8 = por %p54_p5, %p53_p3  ;;  %p127_p10 = scmp.eq.s32.totalorder %s389_s19, 1 }
   0xe   : > { %p658_p9 = por %p121_p6, %p47_p1  ;;  %p417_p13 = scmp.lt.s32.totalorder %s582_s17, 2 }
   0xf   : > { %s663_s26 = scalar_select %p38_p7, %s570_s14, %s40_s21  }
  0x10   : > { %p665_p11 = por %p127_p10, %p53_p3  ;;  %s153_s28 = sand.u32 1, %s570_s14  }
  0x11   : > { %s392_s29 = sshll.u32 %s153_s28, 3  ;;  %s403_s30 = sshll.u32 %s578_s16, 7 }
  0x12   : > { %s762_s27 = scalar_select %p665_p11, 1, 0 }
  0x13   : > { %s165_s6 = scalar_lea.hbm %s755_s0, %s403_s30  ;;  %s157_s7 = scalar_lea.vmem [#allocation2], %s392_s29 }
  0x14   : > { %s167_s8 = sshll.u32 %s157_s7, 4  ;;  %p678_p0 = pnand %p417_p13, %p648_p4  ;;  %s168_s8 = int_to_ptr.vmem [resolvable:$true] %s167_s8 }
  0x15   : > { %p395_p1 = scmp.ge.s32.totalorder %s582_s17, 1  ;;  %p172_p2 = scmp.lt.s32.totalorder %s582_s17, 3 }
  0x16   : > { %s154_s10 = scalar_lea.sflag [#allocation3], %s153_s28  ;;  %p476_p3 = pneg %p678_p0 }
  0x17   : > { %s487_s11 = scalar_lea.vmem %s168_s8, 128  ;;  %s584_s18 = smov [#allocation2]  }
  0x18   : > { %p488_p5 = scmp.ne.s32.totalorder %s168_s8, %s487_s11  ;;  %s492_s19 = sshll.u32 %s584_s18, 4  ;;  %s493_s19 = int_to_ptr.vmem [resolvable:$false] %s492_s19 }
  0x19   : > { %s494_s21 = scalar_lea.vmem %s493_s19, 256  ;;  %p495_p10 = scmp.lt.s32.totalorder %s168_s8, %s493_s19 }
  0x1a   : > { %p490_p6 = pnand %p488_p5, %p476_p3  ;;  %p496_p12 = scmp.lt.s32.totalorder %s494_s21, %s487_s11 }
  0x1c   : > { %p491_p7 = pneg %p490_p6  ;;  %p497_p4 = por %p496_p12, %p495_p10 }
  0x1e   : > { %p498_p13 = pnand %p497_p4, %p491_p7 }
  0x20   : > { %501 = shalt.err (!%p498_p13)
}
  0x21   : > { %412 = dma.hbm_to_vmem [thread:$0]  (!%p678_p0), %s165_s6, 128, %s168_s8, %s154_s10  }
  0x22   : > { %p173_p11 = pnand %p395_p1, %p172_p2 }
  0x23   : > { %s693_s22 = sand.u32 (!%p173_p11), 1, %s566_s13  }
  0x24   : > { %176 = sbr.rel (%p173_p11) target bundleno = 189 (0xbd), region = 32  ;;  %s396_s23 = sshll.u32 (!%p173_p11), %s693_s22, 3 }
  0x25   : > { %s179_s28 = scalar_lea.sflag (!%p173_p11), [#allocation3], %s693_s22  ;;  %s182_s29 = scalar_lea.vmem (!%p173_p11), [#allocation2], %s396_s23 }
  0x29   : > { %553 = dma.done.wait (%p654_p8), %s179_s28, 128  }
  0x2a   : > { %555 = vsyncadd (%p654_p8), %s179_s28, 4294967168  ;;  %v585_v0 = vmov 0   ;;  %v263_v1 = vld [vmem:[%s756_s1] sm:$0xf]  ;;  %vm211_vm0 = vcmask 1043456   ;;  %s404_s24 = sshll.u32 %s574_s15, 7 }
  0x2b   : > { %468 = vset.pattern.permute.xlu0 %v585_v0  ;;  %v274_v2 = vld [vmem:[%s757_s2] sm:$0xf]  ;;  %s204_s7 = scalar_lea.vmem [#allocation5], %s396_s23  ;;  %s302_s11 = scalar_lea.hbm %s758_s3, %s404_s24 }
  0x2c   : > { %266 = vperm.xlu0 %468, %v263_v1   ;;  %v207_v3 = vld [vmem:[%s182_s29] sm:$0xff]  ;;  %s304_s8 = sshll.u32 %s204_s7, 4  ;;  %s288_s18 = scalar_lea.sflag [#allocation4], %s693_s22  ;;  %s305_s8 = int_to_ptr.vmem [resolvable:$true] %s304_s8 }
  0x2d   : > { %v209_v4 = vcombine.high %v207_v3, %v207_v3  ;;  %v212_v5 = vsel %vm211_vm0, %v207_v3, 0.0  ;;  %s502_s19 = scalar_lea.vmem %s305_s8, 128  ;;  %s586_s21 = smov [#allocation5]  }
  0x2e   : > { %v213_v7 = vrot.slane %v212_v5, 4  ;;  %p503_p8 = scmp.ne.s32.totalorder %s305_s8, %s502_s19  ;;  %s506_s15 = sshll.u32 %s586_s21, 4  ;;  %s507_s15 = int_to_ptr.vmem [resolvable:$false] %s506_s15 }
  0x2f   : > { %v219_v6 = vsel %vm211_vm0, %v209_v4, 0.0  ;;  %s508_s23 = scalar_lea.vmem %s507_s15, 256  ;;  %p509_p0 = scmp.lt.s32.totalorder %s305_s8, %s507_s15 }
  0x30   : > { %277 = vperm.xlu0 %468, %v274_v2   ;;  %v220_v8 = vrot.slane %v219_v6, 4  ;;  %v214_v9 = vadd.f32 %v213_v7, %v212_v5  ;;  %p504_p11 = pnand %p503_p8, %p658_p9  ;;  %p510_p1 = scmp.lt.s32.totalorder %s508_s23, %s502_s19 }
  0x32   : > { %v221_v10 = vadd.f32 %v220_v8, %v219_v6  ;;  %v215_v11 = vrot.slane %v214_v9, 2  ;;  %p505_p12 = pneg %p504_p11  ;;  %p511_p2 = por %p510_p1, %p509_p0 }
  0x34   : > { %v222_v12 = vrot.slane %v221_v10, 2  ;;  %v216_v13 = vadd.f32 %v215_v11, %v214_v9  ;;  %p512_p3 = pnand %p511_p2, %p505_p12 }
  0x36   : > { %v223_v14 = vadd.f32 %v222_v12, %v221_v10  ;;  %v217_v15 = vrot.slane %v216_v13, 1 }
  0x38   : > { %v224_v16 = vrot.slane %v223_v14, 1  ;;  %v218_v17 = vadd.f32 %v217_v15, %v216_v13 }
  0x3a   : > { %v225_v18 = vadd.f32 %v224_v16, %v223_v14  ;;  %v227_v19 = vmul.f32 0.25, %v218_v17 }
  0x3c   : > { %v228_v20 = vmul.f32 0.25, %v225_v18 }
  0x3e   : > { %v231_v21 = vcombine.low %v227_v19, %v228_v20 }
  0x40   : > { %v233_v22 = vsub.f32 %v207_v3, %v231_v21 }
  0x42   : > { %v234_v23 = vmul.f32 %v233_v22, %v233_v22 }
  0x44   : > { %v236_v24 = vcombine.high %v234_v23, %v234_v23  ;;  %v238_v25 = vsel %vm211_vm0, %v234_v23, 0.0 }
  0x45   : > { %v239_v27 = vrot.slane %v238_v25, 4 }
  0x46   : > { %v245_v26 = vsel %vm211_vm0, %v236_v24, 0.0 }
  0x47   : > { %v246_v28 = vrot.slane %v245_v26, 4  ;;  %v240_v29 = vadd.f32 %v239_v27, %v238_v25 }
  0x49   : > { %v247_v30 = vadd.f32 %v246_v28, %v245_v26  ;;  %v241_v31 = vrot.slane %v240_v29, 2 }
  0x4b   : > { %v248_v32 = vrot.slane %v247_v30, 2  ;;  %v242_v33 = vadd.f32 %v241_v31, %v240_v29 }
  0x4d   : > { %v249_v34 = vadd.f32 %v248_v32, %v247_v30  ;;  %v243_v35 = vrot.slane %v242_v33, 1 }
  0x4f   : > { %v250_v36 = vrot.slane %v249_v34, 1  ;;  %v244_v37 = vadd.f32 %v243_v35, %v242_v33 }
  0x51   : > { %v251_v38 = vadd.f32 %v250_v36, %v249_v34  ;;  %v252_v39 = vmul.f32 0.25, %v244_v37 }
  0x53   : > { %v253_v40 = vmul.f32 0.25, %v251_v38  ;;  %v254_v41 = vadd.f32 1e-06, %v252_v39 }
  0x55   : > { %v255_v42 = vadd.f32 1e-06, %v253_v40  ;;  %470 = vrsqrt.f32 %v254_v41 }
  0x57   : > { %472 = vrsqrt.f32 %v255_v42 }
  0x62   : > { %v471_v43 = vpop.eup %470 }
  0x64   : > { %v473_v44 = vpop.eup %472 }
  0x65   : > { %v260_v45 = vcombine.low %v471_v43, %v473_v44 }
  0x67   : > { %v262_v46 = vmul.f32 %v260_v45, %v233_v22 }
  0x69   : > { %v270_v47 = vcombine.high %v262_v46, %v262_v46 }
  0xa7   : > { %v267_v48 = vpop.permute.xlu0 %266 }
  0xa8   : > { %v272_v49 = vmul.f32 %v267_v48, %v262_v46  ;;  %v273_v50 = vmul.f32 %v270_v47, %v267_v48 }
  0xab   : > { %v278_v51 = vpop.permute.xlu0 %277 }
  0xac   : > { %v280_v52 = vadd.f32 %v278_v51, %v272_v49  ;;  %v281_v53 = vadd.f32 %v278_v51, %v273_v50 }
  0xae   : > { %v284_v54 = vcombine.low %v280_v52, %v281_v53 }
  0xb0   : > { %286 = vst [vmem:[%s204_s7] sm:$0xff] %v284_v54 }
  0xb1   : > { %515 = shalt.err (!%p512_p3)
}
  0xb2   : > { %s516_s28 = scalar_lea.hbm %s302_s11, 128  ;;  %s520_s30 = scalar_lea.hbm %s758_s3, 256 }
  0xb3   : > { %p517_p5 = scmp.ne.s32.totalorder %s302_s11, %s516_s28  ;;  %p521_p10 = scmp.lt.s32.totalorder %s302_s11, %s758_s3 }
  0xb4   : > { %p522_p4 = scmp.lt.s32.totalorder %s520_s30, %s516_s28 }
  0xb5   : > { %p518_p6 = pnand %p517_p5, %p658_p9 }
  0xb6   : > { %p523_p13 = por %p522_p4, %p521_p10 }
  0xb7   : > { %p519_p7 = pneg %p518_p6 }
  0xb9   : > { %p524_p8 = pnand %p523_p13, %p519_p7 }
  0xbb   : > { %527 = shalt.err (!%p524_p8)
}
  0xbc   : > { %407 = dma.vmem_to_hbm [thread:$0]  (%p658_p9), %s305_s8, 128, %s302_s11, %s288_s18  }
  0xbd PF: > { %s316_s6 = sand.u32 1, %s562_s12   ;;  %p764_p11 = scmp.ne.s32.totalorder %s762_s27, 0 }
  0xbe   : > { %p765_p12 = scmp.ge.s32.totalorder %s582_s17, 2  ;;  %s317_s24 = scalar_lea.sflag [#allocation4], %s316_s6 }
  0xc0   : > { %p414_p0 = pnand %p765_p12, %p764_p11 }
  0xc2   : > { %p415_p1 = pneg %p414_p0 }
  0xc4   : > { %557 = dma.done.wait (%p415_p1), %s317_s24, 128  }
  0xc5   : > { %559 = vsyncadd (%p415_p1), %s317_s24, 4294967168  ;;  %s19_s17 = sadd.s32 1, %s582_s17   ;;  %s766_s12 = smov %s566_s13 }
  0xc6   : > { %p16_p2 = scmp.ge.s32.totalorder %s19_s17, 4   ;;  %s767_s13 = smov %s570_s14 }
  0xc7   : > { %s768_s14 = smov %s663_s26  ;;  %s769_s15 = smov %s578_s16 }
  0xc8   : > { %s770_s16 = smov %s772_s20  ;;  %18 = sbr.rel (!%p16_p2) target bundleno = 6 (0x6), region = 77 }
  0xcd   :  { %322 = vsyncpa [#allocation3], 1 }
  0xce   :  { %324 = vsyncpa [#allocation3 + $0x1], 1 }
  0xcf   :  { %325 = vsyncpa [#allocation4], 1 }
  0xd0   :  { %327 = vsyncpa [#allocation4 + $0x1], 1 }

</bundles_post_ra>
